<compile_context>
chip_gen: v7x
topology: tpu7x:2x2x1
jax: 0.10.0
libtpu: 0.0.40
codegen_flags: <defaults>
</compile_context>

<pallas_src>
import functools

import jax
import jax.numpy as jnp
from jax.experimental import pallas as pl
from jax.experimental.pallas import tpu as pltpu


def autopad(k, p=None):
    if p is None:
        p = k // 2
    return p


def _round_up(a, b):
    return (a + b - 1) // b * b


# -----------------------------------------------------------------------------
# Fused kernel: one (cout_tile, tk) @ (tk, tile_p) MXU step per grid point,
# accumulated in f32 VMEM scratch; BN (scale, bias) + SiLU epilogue on the last
# K step, stored as bf16.
#   p_ref     : (1, 1, tk, tile_p)      bf16   im2col patch tile (spatial on lanes)
#   w_ref     : (1, cout_tile, tk)      bf16   folded conv weight tile
#   scale_ref : (1, cout_tile, 1)       f32    gamma / sqrt(var + eps)
#   bias_ref  : (1, cout_tile, 1)       f32    beta - mean * scale
#   o_ref     : (1, 1, cout_tile, tile_p) bf16
#   acc_ref   : (cout_tile, tile_p)     f32    VMEM accumulator
# -----------------------------------------------------------------------------
def _matmul_bn_silu_kernel(p_ref, w_ref, scale_ref, bias_ref, o_ref, acc_ref):
    kk = pl.program_id(4)

    @pl.when(kk == 0)
    def _():
        acc_ref[...] = jnp.zeros_like(acc_ref)

    acc_ref[...] += jnp.dot(w_ref[0], p_ref[0, 0],
                            preferred_element_type=jnp.float32)

    @pl.when(kk == pl.num_programs(4) - 1)
    def _():
        y = acc_ref[...] * scale_ref[0] + bias_ref[0]
        o_ref[0, 0] = (y * jax.nn.sigmoid(y)).astype(o_ref.dtype)


def _fused_matmul_bn_silu(patches, w2, scale, bias, *,
                          max_tile_p=1024, vmem_budget=24 * 1024 * 1024):
    """patches: (N, G, K, P) bf16; w2: (G, cout_g, K) bf16; scale/bias: (G, cout_g, 1) f32."""
    n, g, kdim, p_len = patches.shape
    cout_g = w2.shape[1]

    # ---- K (contraction) tile: full K when small, else a multiple of 128 that
    #      preferably divides K exactly (avoids a zero-pad copy of the patches).
    if kdim <= 1024:
        tk = kdim
    else:
        tk = 512
        for cand in (512, 384, 256, 128):
            if kdim % cand == 0:
                tk = cand
                break
    k_pad = _round_up(kdim, tk)
    if k_pad != kdim:
        # Zero padding along K is exact (contributes nothing to the accumulation).
        patches = jnp.pad(patches, ((0, 0), (0, 0), (0, k_pad - kdim), (0, 0)))
        w2 = jnp.pad(w2, ((0, 0), (0, 0), (0, k_pad - kdim)))
    num_k = k_pad // tk

    # ---- Cout tile: keep MXU M dimension bounded (<=256) for large layers.
    cout_tile = cout_g
    if cout_g > 256:
        for cand in (256, 128, 64, 32, 16, 8):
            if cout_g % cand == 0:
                cout_tile = cand
                break
    num_c = pl.cdiv(cout_g, cout_tile)

    # ---- Spatial (lane) tile: multiple of 128 under a VMEM working-set budget
    #      (double-buffered inputs/outputs + f32 accumulator).
    def vmem_usage(tp):
        return (2 * tk * tp * 2            # patch block (bf16, double-buffered)
                + 2 * cout_tile * tk * 2   # weight block
                + 2 * cout_tile * tp * 2   # output block (bf16)
                + cout_tile * tp * 4       # f32 accumulator scratch
                + 4 * cout_tile * 4 * 2)   # scale + bias
    tile_p = min(max_tile_p, _round_up(p_len, 128))
    while tile_p > 128 and vmem_usage(tile_p) > vmem_budget:
        tile_p -= 128
    if tile_p >= p_len:
        tile_p = p_len                     # single full-extent spatial block
    num_p = pl.cdiv(p_len, tile_p)

    grid = (n, g, num_c, num_p, num_k)

    cost = pl.CostEstimate(
        flops=2 * n * g * cout_g * k_pad * p_len,
        transcendentals=n * g * cout_g * p_len,
        bytes_accessed=(patches.size * 2 + w2.size * 2
                        + (scale.size + bias.size) * 4
                        + n * g * cout_g * p_len * 2),
    )

    return pl.pallas_call(
        _matmul_bn_silu_kernel,
        out_shape=jax.ShapeDtypeStruct((n, g, cout_g, p_len), jnp.bfloat16),
        grid_spec=pltpu.PrefetchScalarGridSpec(
            num_scalar_prefetch=0,
            grid=grid,
            in_specs=[
                pl.BlockSpec((1, 1, tk, tile_p),
                             lambda b, gi, c, t, kk: (b, gi, kk, t)),
                pl.BlockSpec((1, cout_tile, tk),
                             lambda b, gi, c, t, kk: (gi, c, kk)),
                pl.BlockSpec((1, cout_tile, 1),
                             lambda b, gi, c, t, kk: (gi, c, 0)),
                pl.BlockSpec((1, cout_tile, 1),
                             lambda b, gi, c, t, kk: (gi, c, 0)),
            ],
            out_specs=pl.BlockSpec((1, 1, cout_tile, tile_p),
                                   lambda b, gi, c, t, kk: (b, gi, c, t)),
            scratch_shapes=[pltpu.VMEM((cout_tile, tile_p), jnp.float32)],
        ),
        compiler_params=pltpu.CompilerParams(
            dimension_semantics=("parallel", "parallel", "parallel", "parallel",
                                 "arbitrary"),
            vmem_limit_bytes=48 * 1024 * 1024),
        cost_estimate=cost,
    )(patches, w2, scale, bias)


# -----------------------------------------------------------------------------
# Grouped im2col in NCHW layout (static strided slices; k=1/s=1 is a pure reshape).
# Column ordering of the K axis: ((kh*k + kw) * c1g + ci)   (matches weight reshape).
#   xg : (N, G, c1g, Hp, Wp)  ->  (N, G, c1g*k*k, Ho*Wo)
# -----------------------------------------------------------------------------
def _im2col_grouped(xg, k, s, ho, wo):
    n, g, c1g = xg.shape[:3]
    slabs = []
    for kh in range(k):
        for kw in range(k):
            slabs.append(xg[:, :, :, kh:kh + (ho - 1) * s + 1:s,
                                      kw:kw + (wo - 1) * s + 1:s])
    pat = slabs[0] if len(slabs) == 1 else jnp.concatenate(slabs, axis=2)
    return pat.reshape(n, g, c1g * k * k, ho * wo)


# -----------------------------------------------------------------------------
# Conv module forward (NCHW in / NCHW out), inference semantics (BN folded).
#   weight : (c2, c1//groups, k, k)   (PyTorch OIHW, bias=False)
# -----------------------------------------------------------------------------
def conv_bn_silu(x_nchw, weight, gamma, beta, mean, var, *,
                 stride=1, padding=None, groups=1, eps=1e-3):
    n, c1, h, w = x_nchw.shape
    c2, c1g, k, _ = weight.shape
    assert c1g * groups == c1, "channel/group mismatch"
    assert c2 % groups == 0, "c2 must be divisible by groups"
    pad = autopad(k, padding)

    ho = (h + 2 * pad - k) // stride + 1
    wo = (w + 2 * pad - k) // stride + 1
    cout_g = c2 // groups
    kdim = c1g * k * k

    # Fold BatchNorm into per-channel scale / bias (module uses eps=0.001).
    scale = (gamma / jnp.sqrt(var + eps)).astype(jnp.float32).reshape(groups, cout_g, 1)
    bias_arr = (beta.astype(jnp.float32)
                - mean.astype(jnp.float32) * scale.reshape(-1)).reshape(groups, cout_g, 1)

    # bf16 BEFORE im2col so the k^2-expanded patch tensor only ever exists in bf16.
    xb = x_nchw.astype(jnp.bfloat16).reshape(n, groups, c1g, h, w)
    if pad > 0:
        xb = jnp.pad(xb, ((0, 0), (0, 0), (0, 0), (pad, pad), (pad, pad)))
    patches = _im2col_grouped(xb, k, stride, ho, wo)        # (N, G, kdim, Ho*Wo) bf16

    w2 = weight.reshape(groups, cout_g, c1g, k, k)
    w2 = jnp.transpose(w2, (0, 1, 3, 4, 2)).reshape(groups, cout_g, kdim)
    w2 = w2.astype(jnp.bfloat16)

    out = _fused_matmul_bn_silu(patches, w2, scale, bias_arr)   # (N, G, cout_g, P) bf16
    return out.reshape(n, c2, ho, wo)


# -----------------------------------------------------------------------------
# Pure-JAX reference (same bf16-into-MXU / f32-accumulate numerics as the kernel)
# -----------------------------------------------------------------------------
def conv_bn_silu_reference(x, weight, gamma, beta, mean, var, *,
                           stride=1, padding=None, groups=1, eps=1e-3):
    k = weight.shape[-1]
    p = autopad(k, padding)
    y = jax.lax.conv_general_dilated(
        x.astype(jnp.bfloat16), weight.astype(jnp.bfloat16),
        window_strides=(stride, stride),
        padding=((p, p), (p, p)),
        feature_group_count=groups,
        preferred_element_type=jnp.float32)
    scale = gamma / jnp.sqrt(var + eps)
    bias = beta - mean * scale
    y = y * scale.reshape(1, -1, 1, 1) + bias.reshape(1, -1, 1, 1)
    return y * jax.nn.sigmoid(y)


if __name__ == "__main__":
    key = jax.random.PRNGKey(0)

    def make_params(k_param, c1, c2, k, groups):
        kw_, kg, kb, km, kv = jax.random.split(k_param, 5)
        w = 0.1 * jax.random.normal(kw_, (c2, c1 // groups, k, k), jnp.float32)
        gamma = 1.0 + 0.1 * jax.random.normal(kg, (c2,), jnp.float32)
        beta = 0.1 * jax.random.normal(kb, (c2,), jnp.float32)
        mean = 0.1 * jax.random.normal(km, (c2,), jnp.float32)
        var = jnp.abs(jax.random.normal(kv, (c2,), jnp.float32)) + 0.5
        return w, gamma, beta, mean, var

    k_x, k_p1, k_p2 = jax.random.split(key, 3)
    N, C1, H, W = 2, 4, 16, 16
    C2 = 8
    x = jax.random.normal(k_x, (N, C1, H, W), jnp.float32)

    # Case A: default Conv(c1=4, c2=8) -> 1x1 conv, stride 1 (pure pointwise path)
    pA = make_params(k_p1, C1, C2, 1, 1)
    fA = jax.jit(functools.partial(conv_bn_silu, stride=1, padding=None, groups=1))
    outA = jax.block_until_ready(fA(x, *pA))
    refA = conv_bn_silu_reference(x, *pA, stride=1, padding=None, groups=1)
    assert outA.shape == (N, C2, H, W), outA.shape
    assert jnp.allclose(outA.astype(jnp.float32), refA, atol=2e-2, rtol=2e-2), \
        "mismatch (k=1 path)"

    # Case B: Conv(c1=4, c2=8, k=3, s=2, g=2) -> im2col + strided + grouped path
    pB = make_params(k_p2, C1, C2, 3, 2)
    fB = jax.jit(functools.partial(conv_bn_silu, stride=2, padding=None, groups=2))
    outB = jax.block_until_ready(fB(x, *pB))
    refB = conv_bn_silu_reference(x, *pB, stride=2, padding=None, groups=2)
    assert outB.shape == (N, C2, 8, 8), outB.shape
    assert jnp.allclose(outB.astype(jnp.float32), refB, atol=2e-2, rtol=2e-2), \
        "mismatch (k=3/s=2/g=2 path)"

    print("KERNEL_OK")
</pallas_src>

<mosaic_0001>
module attributes {stable_mosaic.version = 11 : i64} {
  func.func @_matmul_bn_silu_kernel(%arg0: i32, %arg1: i32, %arg2: i32, %arg3: i32, %arg4: i32, %arg5: memref<1x1x4x256xbf16, #tpu.memory_space<vmem>>, %arg6: memref<1x8x4xbf16, #tpu.memory_space<vmem>>, %arg7: memref<1x8x1xf32, #tpu.memory_space<vmem>>, %arg8: memref<1x8x1xf32, #tpu.memory_space<vmem>>, %arg9: memref<1x1x8x256xbf16, #tpu.memory_space<vmem>>, %arg10: memref<8x256xf32, #tpu.memory_space<vmem>>) attributes {dimension_semantics = [#tpu.dimension_semantics<parallel>, #tpu.dimension_semantics<parallel>, #tpu.dimension_semantics<parallel>, #tpu.dimension_semantics<parallel>, #tpu.dimension_semantics<arbitrary>], iteration_bounds = array<i64: 2, 1, 1, 1, 1>, scalar_prefetch = 0 : i64, scratch_operands = 1 : i64, tpu.core_type = #tpu.core_type<tc>, window_params = [{transform_indices = @transform_0, window_bounds = array<i64: 1, 1, 4, 256>}, {transform_indices = @transform_1, window_bounds = array<i64: 1, 8, 4>}, {transform_indices = @transform_2, window_bounds = array<i64: 1, 8, 1>}, {transform_indices = @transform_3, window_bounds = array<i64: 1, 8, 1>}, {transform_indices = @transform_4, window_bounds = array<i64: 1, 1, 8, 256>}]} {
    %c0_i32 = arith.constant 0 : i32
    %0 = arith.cmpi eq, %arg4, %c0_i32 : i32
    %1 = arith.extui %0 : i1 to i32
    %c0_i32_0 = arith.constant 0 : i32
    %2 = arith.cmpi ne, %1, %c0_i32_0 : i32
    scf.if %2 {
      %cst_13 = arith.constant 0.000000e+00 : f32
      %14 = vector.broadcast %cst_13 : f32 to vector<8x256xf32>
      %c0_14 = arith.constant 0 : index
      %c0_15 = arith.constant 0 : index
      %15 = vector.load %arg10[%c0_14, %c0_15] : memref<8x256xf32, #tpu.memory_space<vmem>>, vector<8x256xf32>
      tpu.vector_store %arg10[%c0_14, %c0_15], %14 {strides = array<i32>} : memref<8x256xf32, #tpu.memory_space<vmem>>, vector<8x256xf32>,
    } else {
    }
    %c0 = arith.constant 0 : index
    %c0_1 = arith.constant 0 : index
    %3 = vector.load %arg10[%c0, %c0_1] : memref<8x256xf32, #tpu.memory_space<vmem>>, vector<8x256xf32>
    %c0_2 = arith.constant 0 : index
    %c0_3 = arith.constant 0 : index
    %c0_4 = arith.constant 0 : index
    %4 = vector.load %arg6[%c0_2, %c0_3, %c0_4] : memref<1x8x4xbf16, #tpu.memory_space<vmem>>, vector<1x8x4xbf16>
    %5 = vector.shape_cast %4 : vector<1x8x4xbf16> to vector<8x4xbf16>
    %c0_5 = arith.constant 0 : index
    %c0_6 = arith.constant 0 : index
    %c0_7 = arith.constant 0 : index
    %c0_8 = arith.constant 0 : index
    %6 = vector.load %arg5[%c0_5, %c0_6, %c0_7, %c0_8] : memref<1x1x4x256xbf16, #tpu.memory_space<vmem>>, vector<1x1x4x256xbf16>
    %7 = vector.shape_cast %6 : vector<1x1x4x256xbf16> to vector<4x256xbf16>
    %cst = arith.constant dense<0.000000e+00> : vector<8x256xf32>
    %8 = tpu.matmul %5, %7, %cst {dimension_numbers = #tpu.dot_dimension_numbers<[1], [0], [0], [1], [0, 0, 1, 1], [], []>} : vector<8x4xbf16>, vector<4x256xbf16>, vector<8x256xf32> -> vector<8x256xf32>
    %9 = arith.addf %3, %8 : vector<8x256xf32>
    %c0_9 = arith.constant 0 : index
    %c0_10 = arith.constant 0 : index
    %10 = vector.load %arg10[%c0_9, %c0_10] : memref<8x256xf32, #tpu.memory_space<vmem>>, vector<8x256xf32>
    tpu.vector_store %arg10[%c0_9, %c0_10], %9 {strides = array<i32>} : memref<8x256xf32, #tpu.memory_space<vmem>>, vector<8x256xf32>,
    %c0_i32_11 = arith.constant 0 : i32
    %11 = arith.cmpi eq, %arg4, %c0_i32_11 : i32
    %12 = arith.extui %11 : i1 to i32
    %c0_i32_12 = arith.constant 0 : i32
    %13 = arith.cmpi ne, %12, %c0_i32_12 : i32
    scf.if %13 {
      %c0_13 = arith.constant 0 : index
      %c0_14 = arith.constant 0 : index
      %14 = vector.load %arg10[%c0_13, %c0_14] : memref<8x256xf32, #tpu.memory_space<vmem>>, vector<8x256xf32>
      %c0_15 = arith.constant 0 : index
      %c0_16 = arith.constant 0 : index
      %c0_17 = arith.constant 0 : index
      %15 = vector.load %arg7[%c0_15, %c0_16, %c0_17] : memref<1x8x1xf32, #tpu.memory_space<vmem>>, vector<1x8x1xf32>
      %16 = vector.shape_cast %15 : vector<1x8x1xf32> to vector<8x1xf32>
      %17 = vector.broadcast %16 : vector<8x1xf32> to vector<8x256xf32>
      %18 = arith.mulf %14, %17 : vector<8x256xf32>
      %c0_18 = arith.constant 0 : index
      %c0_19 = arith.constant 0 : index
      %c0_20 = arith.constant 0 : index
      %19 = vector.load %arg8[%c0_18, %c0_19, %c0_20] : memref<1x8x1xf32, #tpu.memory_space<vmem>>, vector<1x8x1xf32>
      %20 = vector.shape_cast %19 : vector<1x8x1xf32> to vector<8x1xf32>
      %21 = vector.broadcast %20 : vector<8x1xf32> to vector<8x256xf32>
      %22 = arith.addf %18, %21 : vector<8x256xf32>
      %23 = arith.negf %22 : vector<8x256xf32>
      %24 = math.exp %23 : vector<8x256xf32>
      %cst_21 = arith.constant 1.000000e+00 : f32
      %25 = vector.broadcast %cst_21 : f32 to vector<8x256xf32>
      %26 = arith.addf %25, %24 : vector<8x256xf32>
      %27 = arith.divf %25, %26 : vector<8x256xf32>
      %28 = arith.mulf %22, %27 : vector<8x256xf32>
      %29 = arith.truncf %28 : vector<8x256xf32> to vector<8x256xbf16>
      %c0_22 = arith.constant 0 : index
      %c0_23 = arith.constant 0 : index
      %c0_24 = arith.constant 0 : index
      %c0_25 = arith.constant 0 : index
      %30 = vector.load %arg9[%c0_22, %c0_23, %c0_24, %c0_25] : memref<1x1x8x256xbf16, #tpu.memory_space<vmem>>, vector<1x1x8x256xbf16>
      %31 = vector.shape_cast %30 : vector<1x1x8x256xbf16> to vector<8x256xbf16>
      %32 = vector.shape_cast %29 : vector<8x256xbf16> to vector<1x1x8x256xbf16>
      tpu.vector_store %arg9[%c0_22, %c0_23, %c0_24, %c0_25], %32 {strides = array<i32>} : memref<1x1x8x256xbf16, #tpu.memory_space<vmem>>, vector<1x1x8x256xbf16>,
    } else {
    }
    return
  }
  func.func @transform_0(%arg0: i32, %arg1: i32, %arg2: i32, %arg3: i32, %arg4: i32) -> (i32, i32, i32, i32) {
    %c0_i32 = arith.constant 0 : i32
    return %arg0, %arg1, %arg4, %arg3 : i32, i32, i32, i32
  }
  func.func @transform_1(%arg0: i32, %arg1: i32, %arg2: i32, %arg3: i32, %arg4: i32) -> (i32, i32, i32) {
    %c0_i32 = arith.constant 0 : i32
    return %arg1, %arg2, %arg4 : i32, i32, i32
  }
  func.func @transform_2(%arg0: i32, %arg1: i32, %arg2: i32, %arg3: i32, %arg4: i32) -> (i32, i32, i32) {
    %c0_i32 = arith.constant 0 : i32
    %c0_i32_0 = arith.constant 0 : i32
    return %arg1, %arg2, %c0_i32 : i32, i32, i32
  }
  func.func @transform_3(%arg0: i32, %arg1: i32, %arg2: i32, %arg3: i32, %arg4: i32) -> (i32, i32, i32) {
    %c0_i32 = arith.constant 0 : i32
    %c0_i32_0 = arith.constant 0 : i32
    return %arg1, %arg2, %c0_i32 : i32, i32, i32
  }
  func.func @transform_4(%arg0: i32, %arg1: i32, %arg2: i32, %arg3: i32, %arg4: i32) -> (i32, i32, i32, i32) {
    %c0_i32 = arith.constant 0 : i32
    return %arg0, %arg1, %arg2, %arg3 : i32, i32, i32, i32
  }
}

</mosaic_0001>

<bundles_post_ra>
// kernel: conv_bn_silu.1
= control target key start
LH: loop header
LB: loop body
LE: loop exit
PB: predicated region body
PF: predicated region fallthrough
CT: control target
= control target key end

     0   :  { %s825_s15 = smov 0   ;;  %s827_s16 = smov 0   ;;  %s871_s0 = inlined_call_operand.vmem [shape: bf16[2,1,4,256], index: 0, kind: input, shape index: {}]   ;;  %s872_s1 = inlined_call_operand.vmem [shape: bf16[1,8,4], index: 1, kind: input, shape index: {}]   ;;  %s873_s2 = inlined_call_operand.vmem [shape: f32[1,8,1], index: 2, kind: input, shape index: {}]   ;;  %s874_s3 = inlined_call_operand.vmem [shape: f32[1,8,1], index: 3, kind: input, shape index: {}]   ;;  %s875_s4 = inlined_call_operand.vmem [shape: bf16[2,1,8,256], index: 4, kind: output, shape index: {}]  }
   0x1   :  { %s829_s17 = smov 0  }
   0x2 LB: > { %s47_s18 = sadd.s32 1, %s793_s16  ;;  %p725_p0 = scmp.ge.s32.totalorder %s797_s17, 1  ;;  %s797_s17 = sphi %s829_s17, %s14_s17   ;;  %s793_s16 = sphi %s827_s16, %s877_s16   ;;  %s789_s15 = sphi %s825_s15, %s876_s15  }
   0x3   : > { %p49_p1 = scmp.ge.s32.totalorder %s47_s18, 2  ;;  %p267_p2 = scmp.lt.s32.totalorder %s797_s17, 3 }
   0x5   : > { %s879_s18 = smov (%p49_p1, %s47_s18), 0  ;;  %p268_p3 = pnand %p725_p0, %p267_p2 }
   0x6   : > { %p342_p4 = scmp.lt.s32.totalorder (!%p268_p3), %s789_s15, 1  ;;  %v799_v0 = vmov (!%p268_p3), 0   ;;  %v482_v1 = vld [vmem:[%s873_s2] sm:$0xff] (!%p268_p3)  ;;  %vm425_vm0 = vcmask (!%p268_p3), 1041408   ;;  %vm421_vm1 = vcmask (!%p268_p3), 31744  }
   0x7   : > { %271 = sbr.rel (%p268_p3) target bundleno = 272 (0x110), region = 36  ;;  %464 = vmatprep.mubr.bf16.mxu0 (!%p268_p3), %v799_v0  ;;  %766 = vset.pattern.permute.xlu0 (!%p268_p3), %v799_v0  ;;  %v490_v2 = vld [vmem:[%s874_s3] sm:$0xff] (!%p268_p3) }
   0x8   : > { %485 = vperm.xlu0 (!%p268_p3), %766, %v482_v1   ;;  %v410_v6 = vld [vmem:[%s872_s1] sm:$0xf] (!%p268_p3) }
   0xc   : > { %493 = vperm.xlu0 (!%p268_p3), %766, %v490_v2  }
   0xe   : > { %s881_s15 = smov (!%p342_p4, %s789_s15), 1 }
   0xf   : > { %s738_s23 = sshll.u32 %s881_s15, 2  ;;  %s739_s29 = sshll.u32 %s881_s15, 3 }
  0x10   : > { %s357_s26 = scalar_lea.vmem %s871_s0, %s738_s23  ;;  %s399_s6 = scalar_lea.vmem %s875_s4, %s739_s29 }
  0x11   : > { %v730_v3 = vld.sshfl [vmem:[%s357_s26] sm:$0x33 pattern:$0x76325410] }
  0x12   : > { %v420_v4 = vcombine.high %v730_v3, %v730_v3  ;;  %v427_v5 = vsel %vm425_vm0, %v730_v3, 0 }
  0x14   : > { %731 = vmatprep.subr.msk.bf16.mxu0 %vm425_vm0, %v420_v4 }
  0x15   : > { %433 = vmatpush1.bf16.msra.mxu0 %v427_v5 }
  0x18   : > { %732 = vmatmul.mubr.msk.bf16.vlgmr.msra.gmra.mrb[0].mxu0 %vm421_vm1, %v410_v6 }
  0x87   : > { %v486_v7 = vpop.permute.xlu0 %485 }
  0x8b   : > { %v494_v11 = vpop.permute.xlu0 %493 }
  0xeb   : > { %v466_v8 = vpop.f32.mrb[0].mxu0 }
  0xec   : > { %v488_v9 = vmul.f32 %v486_v7, %v466_v8  ;;  %v468_v10 = vpop.f32.mrb[1].mxu0 }
  0xed   : > { %v489_v12 = vmul.f32 %v486_v7, %v468_v10  ;;  %v470_v13 = vpop.f32.mrb[2].mxu0 }
  0xee   : > { %v496_v14 = vadd.f32 %v494_v11, %v488_v9  ;;  %v471_v15 = vpop.f32.mrb[3].mxu0 }
  0xef   : > { %v497_v16 = vadd.f32 %v494_v11, %v489_v12 }
  0xf0   : > { %v733_v17 = vmul.f32 -1.442695, %v496_v14 }
  0xf1   : > { %v734_v18 = vmul.f32 -1.442695, %v497_v16 }
  0xf2   : > { %767 = vpow2.f32 %v733_v17 }
  0xf3   : > { %769 = vpow2.f32 %v734_v18 }
  0xfc   : > { %v768_v19 = vpop.eup %767 }
  0xfd   : > { %v770_v20 = vpop.eup %769  ;;  %v504_v21 = vadd.f32 1.0, %v768_v19 }
  0xfe   : > { %v505_v22 = vadd.f32 1.0, %v770_v20 }
  0xff   : > { %771 = vrcp.f32 %v504_v21 }
 0x100   : > { %773 = vrcp.f32 %v505_v22 }
 0x109   : > { %v772_v23 = vpop.eup %771 }
 0x10a   : > { %v774_v24 = vpop.eup %773  ;;  %v510_v25 = vmul.f32 %v772_v23, %v496_v14 }
 0x10b   : > { %v511_v26 = vmul.f32 %v774_v24, %v497_v16 }
 0x10d   : > { %v740_v27 = vpack.c.bf16 %v511_v26, %v510_v25 }
 0x10f   : > { %520 = vst [vmem:[%s399_s6] sm:$0xff] %v740_v27 }
 0x110 PF: > { %s14_s17 = sadd.s32 1, %s797_s17   ;;  %s876_s15 = smov %s793_s16 }
 0x111   : > { %p11_p5 = scmp.ge.s32.totalorder %s14_s17, 4   ;;  %s877_s16 = smov %s879_s18 }
 0x113   :  { %13 = sbr.rel (!%p11_p5) target bundleno = 2 (0x2), region = 83 }

</bundles_post_ra>
